<compile_context>
chip_gen: v5e
topology: v5e:2x2
jax: 0.10.0
libtpu: 0.0.40
codegen_flags: <defaults>
</compile_context>

<pallas_src>
import jax
import jax.numpy as jnp
from jax.experimental import pallas as pl
from jax.experimental.pallas import tpu as pltpu


def _round_up(x, m):
    return (x + m - 1) // m * m


def mlp_kernel(x_ref, w1_ref, b1_ref, w2_ref, b2_ref, w3_ref, b3_ref, o_ref):
    # Layer 1: Linear(D -> H1p) + ReLU (f32 accumulate, f32 elementwise)
    h = jnp.dot(x_ref[...], w1_ref[...], preferred_element_type=jnp.float32)
    h = jnp.maximum(h + b1_ref[...], 0.0)
    # Layer 2: Linear(H1p -> H2p) + ReLU
    h = jnp.dot(h.astype(w2_ref.dtype), w2_ref[...], preferred_element_type=jnp.float32)
    h = jnp.maximum(h + b2_ref[...], 0.0)
    # Layer 3: Linear(H2p -> OUTp), no activation; lane-dense padded output block
    o = jnp.dot(h.astype(w3_ref.dtype), w3_ref[...], preferred_element_type=jnp.float32)
    o_ref[...] = (o + b3_ref[...]).astype(o_ref.dtype)


def arvtdnn_forward(x, params, *, tm_max=512, use_bf16=False):
    """x: (N, input_dim) float32.  params: (in,out)-layout weights, (1,out) biases."""
    N, D = x.shape
    w1, b1 = params["w1"], params["b1"]
    w2, b2 = params["w2"], params["b2"]
    w3, b3 = params["w3"], params["b3"]
    H1, H2, OUT = w1.shape[1], w2.shape[1], w3.shape[1]

    # --- lane-dense zero padding of hidden/output widths (math unchanged) -----------
    H1p, H2p, OUTp = _round_up(H1, 128), _round_up(H2, 128), _round_up(OUT, 128)
    w1p = jnp.pad(w1, ((0, 0), (0, H1p - H1)))
    b1p = jnp.pad(b1, ((0, 0), (0, H1p - H1)))
    w2p = jnp.pad(w2, ((0, H1p - H1), (0, H2p - H2)))
    b2p = jnp.pad(b2, ((0, 0), (0, H2p - H2)))
    w3p = jnp.pad(w3, ((0, H2p - H2), (0, OUTp - OUT)))
    b3p = jnp.pad(b3, ((0, 0), (0, OUTp - OUT)))

    # --- optional bf16 MXU operands (accumulation stays f32 inside the kernel) ------
    compute_dtype = jnp.bfloat16 if use_bf16 else jnp.float32
    xk = x.astype(compute_dtype)
    w1p = w1p.astype(compute_dtype)
    w2p = w2p.astype(compute_dtype)
    w3p = w3p.astype(compute_dtype)
    b1p = b1p.astype(jnp.float32)
    b2p = b2p.astype(jnp.float32)
    b3p = b3p.astype(jnp.float32)

    # --- batch tiling: large tiles; single grid step for tiny batches ---------------
    tm = min(tm_max, _round_up(N, 8))
    Np = _round_up(N, tm)
    if Np != N:
        xk = jnp.pad(xk, ((0, Np - N), (0, 0)))

    grid = (Np // tm,)

    def resident(shape):
        # Weights/biases: constant block index -> stay resident across the batch grid.
        return pl.BlockSpec(shape, lambda i: (0, 0))

    out = pl.pallas_call(
        mlp_kernel,
        out_shape=jax.ShapeDtypeStruct((Np, OUTp), jnp.float32),
        grid_spec=pltpu.PrefetchScalarGridSpec(
            num_scalar_prefetch=0,
            grid=grid,
            in_specs=[
                pl.BlockSpec((tm, D), lambda i: (i, 0)),   # x tile over batch
                resident((D, H1p)),                        # W1
                resident((1, H1p)),                        # b1
                resident((H1p, H2p)),                      # W2
                resident((1, H2p)),                        # b2
                resident((H2p, OUTp)),                     # W3 (lane-dense padded)
                resident((1, OUTp)),                       # b3
            ],
            out_specs=pl.BlockSpec((tm, OUTp), lambda i: (i, 0)),
        ),
        compiler_params=pltpu.CompilerParams(
            dimension_semantics=("parallel",),   # v7x: shard batch steps over 2 TCs
        ),
    )(xk, w1p, b1p, w2p, b2p, w3p, b3p)

    # Strip batch padding and the zero lane-padding of the output.
    return out[:N, :OUT]


def init_params(key, input_dim, hidden_dims=(128, 64), out_dim=2):
    """Deterministic init mimicking nn.Linear default (U(-1/sqrt(fan_in), 1/sqrt(fan_in)))."""
    dims = [input_dim, *hidden_dims, out_dim]
    params = {}
    for idx in range(len(dims) - 1):
        fan_in, fan_out = dims[idx], dims[idx + 1]
        key, kw, kb = jax.random.split(key, 3)
        bound = 1.0 / jnp.sqrt(fan_in)
        # stored as (in, out) so kernel does x @ W
        params[f"w{idx+1}"] = jax.random.uniform(
            kw, (fan_in, fan_out), jnp.float32, minval=-bound, maxval=bound)
        params[f"b{idx+1}"] = jax.random.uniform(
            kb, (1, fan_out), jnp.float32, minval=-bound, maxval=bound)
    return params


def reference_forward(x, params):
    h = jnp.maximum(x @ params["w1"] + params["b1"], 0.0)
    h = jnp.maximum(h @ params["w2"] + params["b2"], 0.0)
    return h @ params["w3"] + params["b3"]


if __name__ == "__main__":
    key = jax.random.PRNGKey(0)
    kx, kx2, kp = jax.random.split(key, 3)

    # ARVTDNN typically consumes memory-polynomial features; pick input_dim=10.
    INPUT_DIM = 10
    params = init_params(kp, INPUT_DIM, hidden_dims=(128, 64), out_dim=2)

    # 1) Small, tile-aligned batch — f32 path, tight tolerance.
    N = 16
    x = jax.random.normal(kx, (N, INPUT_DIM), jnp.float32)
    out = jax.block_until_ready(arvtdnn_forward(x, params))
    ref = reference_forward(x, params)
    assert out.shape == (N, 2)
    assert jnp.allclose(out, ref, atol=1e-5, rtol=1e-5)

    # 2) Non-tile-aligned batch — exercises batch padding path.
    N2 = 13
    x2 = jax.random.normal(kx2, (N2, INPUT_DIM), jnp.float32)
    out2 = jax.block_until_ready(arvtdnn_forward(x2, params))
    ref2 = reference_forward(x2, params)
    assert out2.shape == (N2, 2)
    assert jnp.allclose(out2, ref2, atol=1e-5, rtol=1e-5)

    # 3) bf16 MXU operands (v6e/v7x fast path) — loose tolerance vs f32 reference.
    out_bf16 = jax.block_until_ready(arvtdnn_forward(x, params, use_bf16=True))
    assert out_bf16.shape == (N, 2)
    assert jnp.allclose(out_bf16, ref, atol=1e-1, rtol=1e-1)

    print("KERNEL_OK")
</pallas_src>

<mosaic_0001>
module attributes {stable_mosaic.version = 11 : i64} {
  func.func @mlp_kernel(%arg0: i32, %arg1: memref<16x10xf32, #tpu.memory_space<vmem>>, %arg2: memref<10x128xf32, #tpu.memory_space<vmem>>, %arg3: memref<1x128xf32, #tpu.memory_space<vmem>>, %arg4: memref<128x128xf32, #tpu.memory_space<vmem>>, %arg5: memref<1x128xf32, #tpu.memory_space<vmem>>, %arg6: memref<128x128xf32, #tpu.memory_space<vmem>>, %arg7: memref<1x128xf32, #tpu.memory_space<vmem>>, %arg8: memref<16x128xf32, #tpu.memory_space<vmem>>) attributes {dimension_semantics = [#tpu.dimension_semantics<parallel>], iteration_bounds = array<i64: 1>, scalar_prefetch = 0 : i64, scratch_operands = 0 : i64, tpu.core_type = #tpu.core_type<tc>, window_params = [{transform_indices = @transform_0, window_bounds = array<i64: 16, 10>}, {pipeline_mode = #tpu.pipeline_mode<synchronous>, transform_indices = @transform_1, window_bounds = array<i64: 10, 128>}, {pipeline_mode = #tpu.pipeline_mode<synchronous>, transform_indices = @transform_2, window_bounds = array<i64: 1, 128>}, {pipeline_mode = #tpu.pipeline_mode<synchronous>, transform_indices = @transform_3, window_bounds = array<i64: 128, 128>}, {pipeline_mode = #tpu.pipeline_mode<synchronous>, transform_indices = @transform_4, window_bounds = array<i64: 1, 128>}, {pipeline_mode = #tpu.pipeline_mode<synchronous>, transform_indices = @transform_5, window_bounds = array<i64: 128, 128>}, {pipeline_mode = #tpu.pipeline_mode<synchronous>, transform_indices = @transform_6, window_bounds = array<i64: 1, 128>}, {transform_indices = @transform_7, window_bounds = array<i64: 16, 128>}]} {
    %c0 = arith.constant 0 : index
    %c0_0 = arith.constant 0 : index
    %0 = vector.load %arg1[%c0, %c0_0] : memref<16x10xf32, #tpu.memory_space<vmem>>, vector<16x10xf32>
    %c0_1 = arith.constant 0 : index
    %c0_2 = arith.constant 0 : index
    %1 = vector.load %arg2[%c0_1, %c0_2] : memref<10x128xf32, #tpu.memory_space<vmem>>, vector<10x128xf32>
    %cst = arith.constant dense<0.000000e+00> : vector<16x128xf32>
    %2 = tpu.matmul %0, %1, %cst {dimension_numbers = #tpu.dot_dimension_numbers<[1], [0], [0], [1], [0, 0, 1, 1], [], []>} : vector<16x10xf32>, vector<10x128xf32>, vector<16x128xf32> -> vector<16x128xf32>
    %c0_3 = arith.constant 0 : index
    %c0_4 = arith.constant 0 : index
    %3 = vector.load %arg3[%c0_3, %c0_4] : memref<1x128xf32, #tpu.memory_space<vmem>>, vector<1x128xf32>
    %4 = vector.broadcast %3 : vector<1x128xf32> to vector<16x128xf32>
    %5 = arith.addf %2, %4 : vector<16x128xf32>
    %cst_5 = arith.constant 0.000000e+00 : f32
    %6 = vector.broadcast %cst_5 : f32 to vector<16x128xf32>
    %7 = arith.maximumf %5, %6 : vector<16x128xf32>
    %c0_6 = arith.constant 0 : index
    %c0_7 = arith.constant 0 : index
    %8 = vector.load %arg4[%c0_6, %c0_7] : memref<128x128xf32, #tpu.memory_space<vmem>>, vector<128x128xf32>
    %cst_8 = arith.constant dense<0.000000e+00> : vector<16x128xf32>
    %9 = tpu.matmul %7, %8, %cst_8 {dimension_numbers = #tpu.dot_dimension_numbers<[1], [0], [0], [1], [0, 0, 1, 1], [], []>} : vector<16x128xf32>, vector<128x128xf32>, vector<16x128xf32> -> vector<16x128xf32>
    %c0_9 = arith.constant 0 : index
    %c0_10 = arith.constant 0 : index
    %10 = vector.load %arg5[%c0_9, %c0_10] : memref<1x128xf32, #tpu.memory_space<vmem>>, vector<1x128xf32>
    %11 = vector.broadcast %10 : vector<1x128xf32> to vector<16x128xf32>
    %12 = arith.addf %9, %11 : vector<16x128xf32>
    %cst_11 = arith.constant 0.000000e+00 : f32
    %13 = vector.broadcast %cst_11 : f32 to vector<16x128xf32>
    %14 = arith.maximumf %12, %13 : vector<16x128xf32>
    %c0_12 = arith.constant 0 : index
    %c0_13 = arith.constant 0 : index
    %15 = vector.load %arg6[%c0_12, %c0_13] : memref<128x128xf32, #tpu.memory_space<vmem>>, vector<128x128xf32>
    %cst_14 = arith.constant dense<0.000000e+00> : vector<16x128xf32>
    %16 = tpu.matmul %14, %15, %cst_14 {dimension_numbers = #tpu.dot_dimension_numbers<[1], [0], [0], [1], [0, 0, 1, 1], [], []>} : vector<16x128xf32>, vector<128x128xf32>, vector<16x128xf32> -> vector<16x128xf32>
    %c0_15 = arith.constant 0 : index
    %c0_16 = arith.constant 0 : index
    %17 = vector.load %arg7[%c0_15, %c0_16] : memref<1x128xf32, #tpu.memory_space<vmem>>, vector<1x128xf32>
    %18 = vector.broadcast %17 : vector<1x128xf32> to vector<16x128xf32>
    %19 = arith.addf %16, %18 : vector<16x128xf32>
    %c0_17 = arith.constant 0 : index
    %c0_18 = arith.constant 0 : index
    %20 = vector.load %arg8[%c0_17, %c0_18] : memref<16x128xf32, #tpu.memory_space<vmem>>, vector<16x128xf32>
    tpu.vector_store %arg8[%c0_17, %c0_18], %19 {strides = array<i32>} : memref<16x128xf32, #tpu.memory_space<vmem>>, vector<16x128xf32>,
    return
  }
  func.func @transform_0(%arg0: i32) -> (i32, i32) {
    %c0_i32 = arith.constant 0 : i32
    %c0_i32_0 = arith.constant 0 : i32
    return %arg0, %c0_i32 : i32, i32
  }
  func.func @transform_1(%arg0: i32) -> (i32, i32) {
    %c0_i32 = arith.constant 0 : i32
    %c0_i32_0 = arith.constant 0 : i32
    %c0_i32_1 = arith.constant 0 : i32
    return %c0_i32, %c0_i32_0 : i32, i32
  }
  func.func @transform_2(%arg0: i32) -> (i32, i32) {
    %c0_i32 = arith.constant 0 : i32
    %c0_i32_0 = arith.constant 0 : i32
    %c0_i32_1 = arith.constant 0 : i32
    return %c0_i32, %c0_i32_0 : i32, i32
  }
  func.func @transform_3(%arg0: i32) -> (i32, i32) {
    %c0_i32 = arith.constant 0 : i32
    %c0_i32_0 = arith.constant 0 : i32
    %c0_i32_1 = arith.constant 0 : i32
    return %c0_i32, %c0_i32_0 : i32, i32
  }
  func.func @transform_4(%arg0: i32) -> (i32, i32) {
    %c0_i32 = arith.constant 0 : i32
    %c0_i32_0 = arith.constant 0 : i32
    %c0_i32_1 = arith.constant 0 : i32
    return %c0_i32, %c0_i32_0 : i32, i32
  }
  func.func @transform_5(%arg0: i32) -> (i32, i32) {
    %c0_i32 = arith.constant 0 : i32
    %c0_i32_0 = arith.constant 0 : i32
    %c0_i32_1 = arith.constant 0 : i32
    return %c0_i32, %c0_i32_0 : i32, i32
  }
  func.func @transform_6(%arg0: i32) -> (i32, i32) {
    %c0_i32 = arith.constant 0 : i32
    %c0_i32_0 = arith.constant 0 : i32
    %c0_i32_1 = arith.constant 0 : i32
    return %c0_i32, %c0_i32_0 : i32, i32
  }
  func.func @transform_7(%arg0: i32) -> (i32, i32) {
    %c0_i32 = arith.constant 0 : i32
    %c0_i32_0 = arith.constant 0 : i32
    return %arg0, %c0_i32 : i32, i32
  }
}

</mosaic_0001>

<bundles_post_ra>
// kernel: tpu_custom_call.1
= control target key start
LH: loop header
LB: loop body
LE: loop exit
PB: predicated region body
PF: predicated region fallthrough
CT: control target
= control target key end

     0   :  { %12 = vsyncpa [#allocation3], 0  ;;  %s506_s0 = inlined_call_operand.hbm [shape: f32[16,10], index: 0, kind: input, shape index: {}]   ;;  %s507_s1 = inlined_call_operand.hbm [shape: f32[10,128], index: 1, kind: input, shape index: {}]   ;;  %s508_s2 = inlined_call_operand.vmem [shape: f32[1,128], index: 2, kind: input, shape index: {}]   ;;  %s509_s3 = inlined_call_operand.hbm [shape: f32[128,128], index: 3, kind: input, shape index: {}]   ;;  %s510_s4 = inlined_call_operand.vmem [shape: f32[1,128], index: 4, kind: input, shape index: {}]   ;;  %s511_s5 = inlined_call_operand.hbm [shape: f32[128,128], index: 5, kind: input, shape index: {}]   ;;  %s512_s6 = inlined_call_operand.vmem [shape: f32[1,128], index: 6, kind: input, shape index: {}]   ;;  %s513_s7 = inlined_call_operand.hbm [shape: f32[16,128], index: 7, kind: output, shape index: {}]  }
   0x1   :  { %13 = vsyncpa [#allocation6], 0 }
   0x2   :  { %14 = vsyncpa [#allocation9], 0 }
   0x3   :  { %15 = vsyncpa [#allocation4], 0  ;;  %s33_s26 = sshll.u32 %s507_s1, 4  ;;  %s418_s27 = smov [#allocation5]   ;;  %s34_s26 = int_to_ptr.hbm [resolvable:$true] %s33_s26 }
   0x4   :  { %s35_s28 = sshll.u32 %s418_s27, 4  ;;  %s20_s8 = sshll.u32 %s506_s0, 4  ;;  %s36_s28 = int_to_ptr.vmem [resolvable:$true] %s35_s28  ;;  %s21_s8 = int_to_ptr.hbm [resolvable:$true] %s20_s8 }
   0x5   :  { %s419_s9 = smov 128   ;;  %s420_s10 = smov 8  }
   0x6   :  { %41 = dma.hbm_to_vmem [thread:$0]  %s34_s26, 256, %s36_s28, [#allocation6], %s419_s9, %s419_s9, %s420_s10  }
   0x7   :  { %s421_s11 = smov [#allocation2]   ;;  %s48_s1 = sshll.u32 %s509_s3, 4  ;;  %s49_s1 = int_to_ptr.hbm [resolvable:$true] %s48_s1 }
   0x8   :  { %s22_s12 = sshll.u32 %s421_s11, 4  ;;  %s63_s16 = sshll.u32 %s511_s5, 4  ;;  %s23_s12 = int_to_ptr.vmem [resolvable:$true] %s22_s12  ;;  %s64_s16 = int_to_ptr.hbm [resolvable:$true] %s63_s16 }
   0x9   :  { %28 = dma.hbm_to_vmem [thread:$0]  %s21_s8, 256, %s23_s12, [#allocation3], %s419_s9, %s419_s9, %s420_s10  }
   0xa   :  { %s422_s17 = smov [#allocation7]   ;;  %s423_s19 = smov [#allocation8]  }
   0xb   :  { %s50_s18 = sshll.u32 %s422_s17, 4  ;;  %s65_s3 = sshll.u32 %s423_s19, 4  ;;  %s51_s18 = int_to_ptr.vmem [resolvable:$true] %s50_s18  ;;  %s66_s3 = int_to_ptr.vmem [resolvable:$true] %s65_s3 }
   0xc   :  { %56 = dma.hbm_to_vmem [thread:$0]  %s49_s1, 2048, %s51_s18, [#allocation6], %s419_s9, %s419_s9, %s420_s10  }
   0xd   :  { %71 = dma.hbm_to_vmem [thread:$0]  %s64_s16, 2048, %s66_s3, [#allocation9], %s419_s9, %s419_s9, %s420_s10  }
   0xe   :  { %410 = dma.done.wait [#allocation3], 256  }
   0xf   :  { %411 = vsyncadd [#allocation3], 4294967040 }
  0x10   :  { %412 = dma.done.wait [#allocation6], 2304  }
  0x11   :  { %413 = vsyncadd [#allocation6], 4294964992 }
  0x12   :  { %414 = dma.done.wait [#allocation9], 2048  }
  0x13   :  { %415 = vsyncadd [#allocation9], 4294965248  ;;  %vm105_vm0 = vcmask 1041408   ;;  %v93_v0 = vld [vmem:[#allocation5 + $0x8] sm:$0x3]  ;;  %v92_v1 = vld [vmem:[#allocation5] sm:$0xff] }
  0x14   :  { %245 = vmatpush.msk.msra.mxu0 %vm105_vm0, %v93_v0  ;;  %v90_v2 = vld [vmem:[#allocation2] sm:$0xff]  ;;  %vm98_vm1 = vcmask 80896   ;;  %v149_v3 = vld [vmem:[#allocation7 + $0x78] sm:$0xff]  ;;  %v148_v4 = vld [vmem:[#allocation7 + $0x70] sm:$0xff]  ;;  %s424_s24 = smov [#allocation10]  }
  0x15   :  { %154 = vmatpush.msra.mxu1 %v149_v3  ;;  %248 = vmatpush.msra.mxu3 %v149_v3  ;;  %v147_v5 = vld [vmem:[#allocation7 + $0x68] sm:$0xff]  ;;  %v146_v6 = vld [vmem:[#allocation7 + $0x60] sm:$0xff]  ;;  %v145_v7 = vld [vmem:[#allocation7 + $0x58] sm:$0xff]  ;;  %s228_s25 = sshll.u32 %s424_s24, 4  ;;  %s229_s25 = int_to_ptr.vmem [resolvable:$true] %s228_s25 }
  0x16   :  { %124 = vmatpush.msra.mxu0 %v92_v1  ;;  %v91_v8 = vld [vmem:[#allocation2 + $0x8] sm:$0xff]  ;;  %v144_v9 = vld [vmem:[#allocation7 + $0x50] sm:$0xff]  ;;  %v142_v11 = vld [vmem:[#allocation7 + $0x40] sm:$0xff] }
  0x17   :  { %246 = vmatmul.msk.f32.vlgmr.msra.gmra.mxu0 %vm98_vm1, %v90_v2  ;;  %155 = vmatpush.msra.mxu1 %v148_v4  ;;  %v143_v10 = vld [vmem:[#allocation7 + $0x48] sm:$0xff]  ;;  %v141_v12 = vld [vmem:[#allocation7 + $0x38] sm:$0xff]  ;;  %v140_v13 = vld [vmem:[#allocation7 + $0x30] sm:$0xff] }
  0x18   :  { %249 = vmatpush.msra.mxu3 %v148_v4  ;;  %v139_v14 = vld [vmem:[#allocation7 + $0x28] sm:$0xff]  ;;  %v138_v15 = vld [vmem:[#allocation7 + $0x20] sm:$0xff]  ;;  %v137_v16 = vld [vmem:[#allocation7 + $0x18] sm:$0xff] }
  0x19   :  { %156 = vmatpush.msra.mxu1 %v147_v5  ;;  %v136_v17 = vld [vmem:[#allocation7 + $0x10] sm:$0xff]  ;;  %v135_v18 = vld [vmem:[#allocation7 + $0x8] sm:$0xff]  ;;  %v134_v19 = vld [vmem:[#allocation7] sm:$0xff] }
  0x1a   :  { %250 = vmatpush.msra.mxu3 %v147_v5  ;;  %v194_v20 = vld [vmem:[#allocation8 + $0x78] sm:$0xff]  ;;  %v193_v21 = vld [vmem:[#allocation8 + $0x70] sm:$0xff]  ;;  %v192_v22 = vld [vmem:[#allocation8 + $0x68] sm:$0xff] }
  0x1b   :  { %157 = vmatpush.msra.mxu1 %v146_v6  ;;  %199 = vmatpush.msrb.mxu0 %v194_v20  ;;  %v191_v23 = vld [vmem:[#allocation8 + $0x60] sm:$0xff]  ;;  %v190_v24 = vld [vmem:[#allocation8 + $0x58] sm:$0xff]  ;;  %v189_v25 = vld [vmem:[#allocation8 + $0x50] sm:$0xff] }
  0x1c   :  { %251 = vmatpush.msra.mxu3 %v146_v6  ;;  %264 = vmatpush.msra.mxu2 %v194_v20  ;;  %v188_v26 = vld [vmem:[#allocation8 + $0x48] sm:$0xff]  ;;  %v187_v27 = vld [vmem:[#allocation8 + $0x40] sm:$0xff]  ;;  %v186_v28 = vld [vmem:[#allocation8 + $0x38] sm:$0xff] }
  0x1d   :  { %158 = vmatpush.msra.mxu1 %v145_v7  ;;  %200 = vmatpush.msrb.mxu0 %v193_v21  ;;  %v287_v29 = vld [vmem:[%s508_s2] ss:$0 sm:$0xff]  ;;  %v185_v30 = vld [vmem:[#allocation8 + $0x30] sm:$0xff]  ;;  %v184_v31 = vld [vmem:[#allocation8 + $0x28] sm:$0xff] }
  0x1e   :  { %252 = vmatpush.msra.mxu3 %v145_v7  ;;  %265 = vmatpush.msra.mxu2 %v193_v21  ;;  %v183_v34 = vld [vmem:[#allocation8 + $0x20] sm:$0xff]  ;;  %v182_v36 = vld [vmem:[#allocation8 + $0x18] sm:$0xff]  ;;  %v181_v40 = vld [vmem:[#allocation8 + $0x10] sm:$0xff] }
  0x1f   :  { %247 = vmatmul.msk.f32.gmra.mxu0 %vm98_vm1, %v91_v8  ;;  %159 = vmatpush.msra.mxu1 %v144_v9  ;;  %v180_v41 = vld [vmem:[#allocation8 + $0x8] sm:$0xff]  ;;  %v179_v42 = vld [vmem:[#allocation8] sm:$0xff] }
  0x20   :  { %253 = vmatpush.msra.mxu3 %v144_v9  ;;  %201 = vmatpush.msrb.mxu0 %v192_v22  ;;  %v288_v43 = vld [vmem:[%s510_s4] ss:$0 sm:$0xff]  ;;  %s230_s4 = sshll.u32 %s513_s7, 4  ;;  %s231_s4 = int_to_ptr.hbm [resolvable:$true] %s230_s4 }
  0x21   :  { %160 = vmatpush.msra.mxu1 %v143_v10  ;;  %266 = vmatpush.msra.mxu2 %v192_v22  ;;  %v289_v50 = vld [vmem:[%s512_s6] ss:$0 sm:$0xff] }
  0x22   :  { %254 = vmatpush.msra.mxu3 %v143_v10  ;;  %202 = vmatpush.msrb.mxu0 %v191_v23 }
  0x23   :  { %161 = vmatpush.msra.mxu1 %v142_v11  ;;  %267 = vmatpush.msra.mxu2 %v191_v23 }
  0x24   :  { %255 = vmatpush.msra.mxu3 %v142_v11  ;;  %203 = vmatpush.msrb.mxu0 %v190_v24 }
  0x25   :  { %162 = vmatpush.msra.mxu1 %v141_v12  ;;  %268 = vmatpush.msra.mxu2 %v190_v24 }
  0x26   :  { %256 = vmatpush.msra.mxu3 %v141_v12  ;;  %204 = vmatpush.msrb.mxu0 %v189_v25 }
  0x27   :  { %163 = vmatpush.msra.mxu1 %v140_v13  ;;  %269 = vmatpush.msra.mxu2 %v189_v25 }
  0x28   :  { %257 = vmatpush.msra.mxu3 %v140_v13  ;;  %205 = vmatpush.msrb.mxu0 %v188_v26 }
  0x29   :  { %164 = vmatpush.msra.mxu1 %v139_v14  ;;  %270 = vmatpush.msra.mxu2 %v188_v26 }
  0x2a   :  { %258 = vmatpush.msra.mxu3 %v139_v14  ;;  %206 = vmatpush.msrb.mxu0 %v187_v27 }
  0x2b   :  { %165 = vmatpush.msra.mxu1 %v138_v15  ;;  %271 = vmatpush.msra.mxu2 %v187_v27 }
  0x2c   :  { %259 = vmatpush.msra.mxu3 %v138_v15  ;;  %207 = vmatpush.msrb.mxu0 %v186_v28 }
  0x2d   :  { %166 = vmatpush.msra.mxu1 %v137_v16  ;;  %272 = vmatpush.msra.mxu2 %v186_v28 }
  0x2e   :  { %260 = vmatpush.msra.mxu3 %v137_v16  ;;  %208 = vmatpush.msrb.mxu0 %v185_v30 }
  0x2f   :  { %167 = vmatpush.msra.mxu1 %v136_v17  ;;  %273 = vmatpush.msra.mxu2 %v185_v30 }
  0x30   :  { %261 = vmatpush.msra.mxu3 %v136_v17  ;;  %209 = vmatpush.msrb.mxu0 %v184_v31 }
  0x31   :  { %168 = vmatpush.msra.mxu1 %v135_v18  ;;  %274 = vmatpush.msra.mxu2 %v184_v31 }
  0x32   :  { %262 = vmatpush.msra.mxu3 %v135_v18  ;;  %210 = vmatpush.msrb.mxu0 %v183_v34 }
  0x33   :  { %169 = vmatpush.msra.mxu1 %v134_v19  ;;  %275 = vmatpush.msra.mxu2 %v183_v34 }
  0x34   :  { %263 = vmatpush.msra.mxu3 %v134_v19  ;;  %211 = vmatpush.msrb.mxu0 %v182_v36 }
  0x35   :  { %276 = vmatpush.msra.mxu2 %v182_v36 }
  0x36   :  { %212 = vmatpush.msrb.mxu0 %v181_v40 }
  0x37   :  { %277 = vmatpush.msra.mxu2 %v181_v40 }
  0x38   :  { %213 = vmatpush.msrb.mxu0 %v180_v41 }
  0x39   :  { %278 = vmatpush.msra.mxu2 %v180_v41 }
  0x3a   :  { %214 = vmatpush.msrb.mxu0 %v179_v42 }
  0x3b   :  { %279 = vmatpush.msra.mxu2 %v179_v42 }
  0x94   :  { %v126_v32 = vpop.f32.mrf.mxu0 }
  0x95   :  { %v127_v33 = vadd.f32 %v287_v29, %v126_v32 }
  0x97   :  { %v132_v35 = vmax.f32 %v127_v33, 0.0 }
  0x99   :  { %170 = vmatmul.f32.vlgmr.msra.gmra.mxu1 %v132_v35 }
  0x9c   :  { %v129_v37 = vpop.f32.mrf.mxu0 }
  0x9d   :  { %v130_v38 = vadd.f32 %v287_v29, %v129_v37 }
  0x9f   :  { %v133_v39 = vmax.f32 %v130_v38, 0.0 }
  0xa1   :  { %173 = vmatmul.f32.vlgmr.msra.gmra.mxu3 %v133_v39 }
 0x116   :  { %v171_v44 = vpop.f32.mrf.mxu1 }
 0x117   :  { %v172_v45 = vadd.f32 %v288_v43, %v171_v44 }
 0x119   :  { %v177_v46 = vmax.f32 %v172_v45, 0.0 }
 0x11b   :  { %215 = vmatmul.f32.vlgmr.msrb.gmra.mxu0 %v177_v46 }
 0x124   :  { %v174_v47 = vpop.f32.mrf.mxu3 }
 0x125   :  { %v175_v48 = vadd.f32 %v288_v43, %v174_v47 }
 0x127   :  { %v178_v49 = vmax.f32 %v175_v48, 0.0 }
 0x129   :  { %218 = vmatmul.f32.vlgmr.msra.gmra.mxu2 %v178_v49 }
 0x198   :  { %v216_v51 = vpop.f32.mrf.mxu0 }
 0x199   :  { %v217_v52 = vadd.f32 %v289_v50, %v216_v51 }
 0x19b   :  { %222 = vst [vmem:[#allocation10] sm:$0xff] %v217_v52 }
 0x1ac   :  { %v219_v53 = vpop.f32.mrf.mxu2 }
 0x1ad   :  { %v220_v54 = vadd.f32 %v289_v50, %v219_v53 }
 0x1af   :  { %223 = vst [vmem:[#allocation10 + $0x8] sm:$0xff] %v220_v54 }
 0x1b0   :  { %236 = dma.vmem_to_hbm [thread:$0]  %s229_s25, 256, %s231_s4, [#allocation4], %s419_s9, %s419_s9, %s420_s10  }
 0x1b1   :  { %416 = dma.done.wait [#allocation4], 256  }
 0x1b2   :  { %417 = vsyncadd [#allocation4], 4294967040 }
 0x1b3   :  { %241 = vsyncpa [#allocation3], 1 }
 0x1b4   :  { %242 = vsyncpa [#allocation6], 1 }
 0x1b5   :  { %243 = vsyncpa [#allocation9], 1 }
 0x1b6   :  { %244 = vsyncpa [#allocation4], 1 }

</bundles_post_ra>
